<compile_context>
chip_gen: v5e
topology: v5e:2x2
jax: 0.10.0
libtpu: 0.0.40
codegen_flags: <defaults>
</compile_context>

<pallas_src>
import math

import jax
import jax.numpy as jnp
from jax.experimental import pallas as pl
from jax.experimental.pallas import tpu as pltpu

_EPS = 1e-4
_LANES = 128
_MAX_ROW_TILE = 2048  # 4 inputs x 2 buffers x 2048x128x4B = 8 MiB VMEM (f32)
_INV_LN2 = 1.0 / math.log(2.0)
_LOG_EPS = math.log(_EPS)
_LOG_ONE_MINUS_EPS = math.log(1.0 - _EPS)


def _uncertainty_loss_kernel(pm_ref, lv_ref, ev_ref, gt_ref, out_ref, acc_ref):
    inner = pl.program_id(1)

    @pl.when(inner == 0)
    def _():
        acc_ref[...] = jnp.zeros_like(acc_ref)

    pm = pm_ref[...].astype(jnp.float32)
    lv = lv_ref[...].astype(jnp.float32)
    ev = ev_ref[...].astype(jnp.float32)
    gt = gt_ref[...].astype(jnp.float32)

    # Single EUP transcendental per element.
    half_neg_lv = -0.5 * lv
    e = jnp.exp(half_neg_lv)                       # exp(-0.5*lv)

    # Gaussian NLL-style term: (pm-ev)^2 / (2*exp(lv)) + 0.5*lv
    diff_mean = pm - ev
    term_nll = 0.5 * diff_mean * diff_mean * e * e + 0.5 * lv

    # Entropy of clamp(exp(-0.5*lv), eps, 1-eps) in bits; log rewritten as a
    # clip of -0.5*lv (exact: log is monotone).
    p = jnp.clip(e, _EPS, 1.0 - _EPS)
    log2_p = jnp.clip(half_neg_lv, _LOG_EPS, _LOG_ONE_MINUS_EPS) * _INV_LN2
    term_entropy = -(p * log2_p)

    # Estimator MSE term.
    diff_est = ev - gt
    term_mse = diff_est * diff_est

    vals = term_nll + term_entropy + term_mse       # (row_tile, 128)
    # Fold into a vreg-shaped partial with VPU adds only (no per-step XLU).
    acc_ref[...] += jnp.sum(vals.reshape(-1, 8, _LANES), axis=0)

    @pl.when(inner == pl.num_programs(1) - 1)
    def _():
        # One cross-sublane reduction per parallel block; lane-dense store.
        out_ref[...] = jnp.sum(acc_ref[...], axis=0, keepdims=True)  # (1,128)


def _pick_row_tile(rows):
    """Largest multiple-of-8 divisor of `rows` that is <= _MAX_ROW_TILE."""
    t = min(rows, _MAX_ROW_TILE)
    t -= t % 8
    while t >= 8:
        if rows % t == 0:
            return t
        t -= 8
    return 8


def uncertainty_loss(pred_mean, pred_logvar, estimated_value, gt):
    assert pred_mean.shape == pred_logvar.shape == estimated_value.shape == gt.shape
    total_n = pred_mean.size
    assert total_n % (8 * _LANES) == 0, (
        "element count must be divisible by 8*128 for this simple tiling")
    rows = total_n // _LANES

    row_tile = _pick_row_tile(rows)
    n_blocks = rows // row_tile

    # Outer "parallel" axis (v7x dual-TensorCore; harmless elsewhere).
    n_parallel = 1
    for cand in (8, 4, 2):
        if n_blocks % cand == 0:
            n_parallel = cand
            break
    n_inner = n_blocks // n_parallel

    def flat(x):
        # Native dtype: upcast happens inside the kernel after the DMA load.
        return x.reshape(rows, _LANES)

    pm, lv, ev, g = flat(pred_mean), flat(pred_logvar), flat(estimated_value), flat(gt)

    in_spec = pl.BlockSpec((row_tile, _LANES),
                           lambda p, i: (p * n_inner + i, 0))

    partials = pl.pallas_call(
        _uncertainty_loss_kernel,
        out_shape=jax.ShapeDtypeStruct((n_parallel, _LANES), jnp.float32),
        grid_spec=pltpu.PrefetchScalarGridSpec(
            num_scalar_prefetch=0,
            grid=(n_parallel, n_inner),
            in_specs=[in_spec, in_spec, in_spec, in_spec],
            out_specs=pl.BlockSpec((1, _LANES), lambda p, i: (p, 0)),
            scratch_shapes=[pltpu.VMEM((8, _LANES), jnp.float32)],
        ),
        compiler_params=pltpu.CompilerParams(
            dimension_semantics=("parallel", "arbitrary")),
    )(pm, lv, ev, g)

    # Tiny final reduction + the single divide (all three torch.mean calls are
    # over the same element count, so one fused sum / N is exact).
    return jnp.sum(partials) * (1.0 / total_n)


def _reference_loss(pred_mean, pred_logvar, estimated_value, gt):
    pred_var = jnp.exp(pred_logvar)
    sq_diff_mean = (pred_mean - estimated_value) ** 2
    sq_diff_est = (estimated_value - gt) ** 2
    loss = jnp.mean(sq_diff_mean / (2.0 * pred_var) + 0.5 * pred_logvar)
    p = jnp.clip(jnp.exp(-0.5 * pred_logvar), _EPS, 1.0 - _EPS)
    entropy = -jnp.mean(p * jnp.log2(p))
    return loss + entropy + jnp.mean(sq_diff_est)


if __name__ == "__main__":
    key = jax.random.PRNGKey(0)
    k1, k2, k3, k4 = jax.random.split(key, 4)
    shape = (2, 4, 16, 16)  # NCHW; total elements = 2048 = 16 * 128
    pred_mean = jax.random.normal(k1, shape, dtype=jnp.float32)
    pred_logvar = 0.5 * jax.random.normal(k2, shape, dtype=jnp.float32)
    estimated_value = jax.random.normal(k3, shape, dtype=jnp.float32)
    gt = jax.random.normal(k4, shape, dtype=jnp.float32)

    loss = uncertainty_loss(pred_mean, pred_logvar, estimated_value, gt)
    jax.block_until_ready(loss)

    ref = _reference_loss(pred_mean, pred_logvar, estimated_value, gt)
    assert jnp.allclose(loss, ref, rtol=1e-5, atol=1e-5), (loss, ref)
    print("KERNEL_OK")
</pallas_src>

<mosaic_0001>
module attributes {stable_mosaic.version = 11 : i64} {
  func.func @_uncertainty_loss_kernel(%arg0: i32, %arg1: i32, %arg2: memref<16x128xf32, #tpu.memory_space<vmem>>, %arg3: memref<16x128xf32, #tpu.memory_space<vmem>>, %arg4: memref<16x128xf32, #tpu.memory_space<vmem>>, %arg5: memref<16x128xf32, #tpu.memory_space<vmem>>, %arg6: memref<1x128xf32, #tpu.memory_space<vmem>>, %arg7: memref<8x128xf32, #tpu.memory_space<vmem>>) attributes {dimension_semantics = [#tpu.dimension_semantics<parallel>, #tpu.dimension_semantics<arbitrary>], iteration_bounds = array<i64: 1, 1>, scalar_prefetch = 0 : i64, scratch_operands = 1 : i64, tpu.core_type = #tpu.core_type<tc>, window_params = [{transform_indices = @transform_0, window_bounds = array<i64: 16, 128>}, {transform_indices = @transform_1, window_bounds = array<i64: 16, 128>}, {transform_indices = @transform_2, window_bounds = array<i64: 16, 128>}, {transform_indices = @transform_3, window_bounds = array<i64: 16, 128>}, {transform_indices = @transform_4, window_bounds = array<i64: 1, 128>}]} {
    %c0_i32 = arith.constant 0 : i32
    %0 = arith.cmpi eq, %arg1, %c0_i32 : i32
    %1 = arith.extui %0 : i1 to i32
    %c0_i32_0 = arith.constant 0 : i32
    %2 = arith.cmpi ne, %1, %c0_i32_0 : i32
    scf.if %2 {
      %cst_23 = arith.constant 0.000000e+00 : f32
      %44 = vector.broadcast %cst_23 : f32 to vector<8x128xf32>
      %c0_24 = arith.constant 0 : index
      %c0_25 = arith.constant 0 : index
      %45 = vector.load %arg7[%c0_24, %c0_25] : memref<8x128xf32, #tpu.memory_space<vmem>>, vector<8x128xf32>
      tpu.vector_store %arg7[%c0_24, %c0_25], %44 {strides = array<i32>} : memref<8x128xf32, #tpu.memory_space<vmem>>, vector<8x128xf32>,
    } else {
    }
    %c0 = arith.constant 0 : index
    %c0_1 = arith.constant 0 : index
    %3 = vector.load %arg2[%c0, %c0_1] : memref<16x128xf32, #tpu.memory_space<vmem>>, vector<16x128xf32>
    %c0_2 = arith.constant 0 : index
    %c0_3 = arith.constant 0 : index
    %4 = vector.load %arg3[%c0_2, %c0_3] : memref<16x128xf32, #tpu.memory_space<vmem>>, vector<16x128xf32>
    %c0_4 = arith.constant 0 : index
    %c0_5 = arith.constant 0 : index
    %5 = vector.load %arg4[%c0_4, %c0_5] : memref<16x128xf32, #tpu.memory_space<vmem>>, vector<16x128xf32>
    %c0_6 = arith.constant 0 : index
    %c0_7 = arith.constant 0 : index
    %6 = vector.load %arg5[%c0_6, %c0_7] : memref<16x128xf32, #tpu.memory_space<vmem>>, vector<16x128xf32>
    %cst = arith.constant -5.000000e-01 : f32
    %7 = vector.broadcast %cst : f32 to vector<16x128xf32>
    %8 = arith.mulf %7, %4 : vector<16x128xf32>
    %9 = math.exp %8 : vector<16x128xf32>
    %10 = arith.subf %3, %5 : vector<16x128xf32>
    %cst_8 = arith.constant 5.000000e-01 : f32
    %11 = vector.broadcast %cst_8 : f32 to vector<16x128xf32>
    %12 = arith.mulf %11, %10 : vector<16x128xf32>
    %13 = arith.mulf %12, %10 : vector<16x128xf32>
    %14 = arith.mulf %13, %9 : vector<16x128xf32>
    %15 = arith.mulf %14, %9 : vector<16x128xf32>
    %cst_9 = arith.constant 5.000000e-01 : f32
    %16 = vector.broadcast %cst_9 : f32 to vector<16x128xf32>
    %17 = arith.mulf %16, %4 : vector<16x128xf32>
    %18 = arith.addf %15, %17 : vector<16x128xf32>
    %cst_10 = arith.constant 9.99999974E-5 : f32
    %cst_11 = arith.constant 0.999899983 : f32
    %19 = vector.broadcast %cst_10 : f32 to vector<16x128xf32>
    %20 = arith.maximumf %19, %9 : vector<16x128xf32>
    %21 = vector.broadcast %cst_11 : f32 to vector<16x128xf32>
    %22 = arith.minimumf %21, %20 : vector<16x128xf32>
    %cst_12 = arith.constant -9.21034049 : f32
    %cst_13 = arith.constant -1.000050e-04 : f32
    %23 = vector.broadcast %cst_12 : f32 to vector<16x128xf32>
    %24 = arith.maximumf %23, %8 : vector<16x128xf32>
    %25 = vector.broadcast %cst_13 : f32 to vector<16x128xf32>
    %26 = arith.minimumf %25, %24 : vector<16x128xf32>
    %cst_14 = arith.constant 1.44269502 : f32
    %27 = vector.broadcast %cst_14 : f32 to vector<16x128xf32>
    %28 = arith.mulf %26, %27 : vector<16x128xf32>
    %29 = arith.mulf %22, %28 : vector<16x128xf32>
    %cst_15 = arith.constant 0.000000e+00 : f32
    %30 = vector.broadcast %cst_15 : f32 to vector<16x128xf32>
    %31 = arith.subf %30, %29 : vector<16x128xf32>
    %32 = arith.subf %5, %6 : vector<16x128xf32>
    %33 = arith.mulf %32, %32 : vector<16x128xf32>
    %34 = arith.addf %18, %31 : vector<16x128xf32>
    %35 = arith.addf %34, %33 : vector<16x128xf32>
    %c0_16 = arith.constant 0 : index
    %c0_17 = arith.constant 0 : index
    %36 = vector.load %arg7[%c0_16, %c0_17] : memref<8x128xf32, #tpu.memory_space<vmem>>, vector<8x128xf32>
    %37 = vector.shape_cast %35 : vector<16x128xf32> to vector<2x8x128xf32>
    %cst_18 = arith.constant dense<0.000000e+00> : vector<8x128xf32>
    %38 = vector.multi_reduction <add>, %37, %cst_18 [0] : vector<2x8x128xf32> to vector<8x128xf32>
    %39 = arith.addf %36, %38 : vector<8x128xf32>
    %c0_19 = arith.constant 0 : index
    %c0_20 = arith.constant 0 : index
    %40 = vector.load %arg7[%c0_19, %c0_20] : memref<8x128xf32, #tpu.memory_space<vmem>>, vector<8x128xf32>
    tpu.vector_store %arg7[%c0_19, %c0_20], %39 {strides = array<i32>} : memref<8x128xf32, #tpu.memory_space<vmem>>, vector<8x128xf32>,
    %c0_i32_21 = arith.constant 0 : i32
    %41 = arith.cmpi eq, %arg1, %c0_i32_21 : i32
    %42 = arith.extui %41 : i1 to i32
    %c0_i32_22 = arith.constant 0 : i32
    %43 = arith.cmpi ne, %42, %c0_i32_22 : i32
    scf.if %43 {
      %c0_23 = arith.constant 0 : index
      %c0_24 = arith.constant 0 : index
      %44 = vector.load %arg7[%c0_23, %c0_24] : memref<8x128xf32, #tpu.memory_space<vmem>>, vector<8x128xf32>
      %cst_25 = arith.constant dense<0.000000e+00> : vector<128xf32>
      %45 = vector.multi_reduction <add>, %44, %cst_25 [0] : vector<8x128xf32> to vector<128xf32>
      %46 = vector.shape_cast %45 : vector<128xf32> to vector<1x128xf32>
      %c0_26 = arith.constant 0 : index
      %c0_27 = arith.constant 0 : index
      %47 = vector.load %arg6[%c0_26, %c0_27] : memref<1x128xf32, #tpu.memory_space<vmem>>, vector<1x128xf32>
      tpu.vector_store %arg6[%c0_26, %c0_27], %46 {strides = array<i32>} : memref<1x128xf32, #tpu.memory_space<vmem>>, vector<1x128xf32>,
    } else {
    }
    return
  }
  func.func @transform_0(%arg0: i32, %arg1: i32) -> (i32, i32) {
    %c1_i32 = arith.constant 1 : i32
    %0 = arith.muli %arg0, %c1_i32 : i32
    %1 = arith.addi %0, %arg1 : i32
    %c0_i32 = arith.constant 0 : i32
    %c0_i32_0 = arith.constant 0 : i32
    return %1, %c0_i32 : i32, i32
  }
  func.func @transform_1(%arg0: i32, %arg1: i32) -> (i32, i32) {
    %c1_i32 = arith.constant 1 : i32
    %0 = arith.muli %arg0, %c1_i32 : i32
    %1 = arith.addi %0, %arg1 : i32
    %c0_i32 = arith.constant 0 : i32
    %c0_i32_0 = arith.constant 0 : i32
    return %1, %c0_i32 : i32, i32
  }
  func.func @transform_2(%arg0: i32, %arg1: i32) -> (i32, i32) {
    %c1_i32 = arith.constant 1 : i32
    %0 = arith.muli %arg0, %c1_i32 : i32
    %1 = arith.addi %0, %arg1 : i32
    %c0_i32 = arith.constant 0 : i32
    %c0_i32_0 = arith.constant 0 : i32
    return %1, %c0_i32 : i32, i32
  }
  func.func @transform_3(%arg0: i32, %arg1: i32) -> (i32, i32) {
    %c1_i32 = arith.constant 1 : i32
    %0 = arith.muli %arg0, %c1_i32 : i32
    %1 = arith.addi %0, %arg1 : i32
    %c0_i32 = arith.constant 0 : i32
    %c0_i32_0 = arith.constant 0 : i32
    return %1, %c0_i32 : i32, i32
  }
  func.func @transform_4(%arg0: i32, %arg1: i32) -> (i32, i32) {
    %c0_i32 = arith.constant 0 : i32
    %c0_i32_0 = arith.constant 0 : i32
    return %arg0, %c0_i32 : i32, i32
  }
}

</mosaic_0001>

<bundles_post_ra>
// kernel: tpu_custom_call.1
= control target key start
LH: loop header
LB: loop body
LE: loop exit
PB: predicated region body
PF: predicated region fallthrough
CT: control target
= control target key end

     0   :  { %9 = vsyncpa [#allocation4], 0  ;;  %s380_s0 = inlined_call_operand.hbm [shape: f32[16,128], index: 0, kind: input, shape index: {}]   ;;  %s381_s1 = inlined_call_operand.hbm [shape: f32[16,128], index: 1, kind: input, shape index: {}]   ;;  %s382_s2 = inlined_call_operand.hbm [shape: f32[16,128], index: 2, kind: input, shape index: {}]   ;;  %s383_s3 = inlined_call_operand.hbm [shape: f32[16,128], index: 3, kind: input, shape index: {}]   ;;  %s384_s4 = inlined_call_operand.hbm [shape: f32[1,128], index: 4, kind: output, shape index: {}]  }
   0x1   :  { %10 = vsyncpa [#allocation7], 0 }
   0x2   :  { %11 = vsyncpa [#allocation10], 0 }
   0x3   :  { %12 = vsyncpa [#allocation5], 0  ;;  %s38_s17 = sshll.u32 %s381_s1, 4  ;;  %s333_s18 = smov [#allocation6]   ;;  %s39_s17 = int_to_ptr.hbm [resolvable:$true] %s38_s17 }
   0x4   :  { %s40_s19 = sshll.u32 %s333_s18, 4  ;;  %s21_s22 = sshll.u32 %s380_s0, 4  ;;  %s41_s19 = int_to_ptr.vmem [resolvable:$true] %s40_s19  ;;  %s22_s22 = int_to_ptr.hbm [resolvable:$true] %s21_s22 }
   0x5   :  { %s334_s23 = smov 128   ;;  %s335_s24 = smov 8  }
   0x6   :  { %46 = dma.hbm_to_vmem [thread:$0]  %s39_s17, 256, %s41_s19, [#allocation7], %s334_s23, %s334_s23, %s335_s24  }
   0x7   :  { %s336_s25 = smov [#allocation3]   ;;  %s55_s29 = sshll.u32 %s382_s2, 4  ;;  %s56_s29 = int_to_ptr.hbm [resolvable:$true] %s55_s29 }
   0x8   :  { %s23_s26 = sshll.u32 %s336_s25, 4  ;;  %s72_s5 = sshll.u32 %s383_s3, 4  ;;  %s24_s26 = int_to_ptr.vmem [resolvable:$true] %s23_s26  ;;  %s73_s5 = int_to_ptr.hbm [resolvable:$true] %s72_s5 }
   0x9   :  { %29 = dma.hbm_to_vmem [thread:$0]  %s22_s22, 256, %s24_s26, [#allocation4], %s334_s23, %s334_s23, %s335_s24  }
   0xa   :  { %s337_s6 = smov [#allocation8]   ;;  %s338_s0 = smov [#allocation9]  }
   0xb   :  { %s57_s7 = sshll.u32 %s337_s6, 4  ;;  %s74_s8 = sshll.u32 %s338_s0, 4  ;;  %s58_s7 = int_to_ptr.vmem [resolvable:$true] %s57_s7  ;;  %s75_s8 = int_to_ptr.vmem [resolvable:$true] %s74_s8 }
   0xc   :  { %63 = dma.hbm_to_vmem [thread:$0]  %s56_s29, 256, %s58_s7, [#allocation7], %s334_s23, %s334_s23, %s335_s24  }
   0xd   :  { %80 = dma.hbm_to_vmem [thread:$0]  %s73_s5, 256, %s75_s8, [#allocation10], %s334_s23, %s334_s23, %s335_s24  }
   0xe   :  { %325 = dma.done.wait [#allocation4], 256  }
   0xf   :  { %326 = vsyncadd [#allocation4], 4294967040 }
  0x10   :  { %327 = dma.done.wait [#allocation7], 512  }
  0x11   :  { %328 = vsyncadd [#allocation7], 4294966784 }
  0x12   :  { %329 = dma.done.wait [#allocation10], 256  }
  0x13   :  { %330 = vsyncadd [#allocation10], 4294967040  ;;  %v110_v0 = vld [vmem:[#allocation3] sm:$0xff]  ;;  %v111_v1 = vld [vmem:[#allocation3 + $0x8] sm:$0xff]  ;;  %s339_s2 = smov [#allocation11]   ;;  %s182_s11 = sshll.u32 %s384_s4, 4  ;;  %s183_s11 = int_to_ptr.hbm [resolvable:$true] %s182_s11 }
  0x14   :  { %v112_v2 = vld [vmem:[#allocation6] sm:$0xff]  ;;  %v113_v3 = vld [vmem:[#allocation6 + $0x8] sm:$0xff]  ;;  %v114_v4 = vld [vmem:[#allocation8] sm:$0xff]  ;;  %s180_s3 = sshll.u32 %s339_s2, 4  ;;  %s181_s3 = int_to_ptr.vmem [resolvable:$true] %s180_s3 }
  0x15   :  { %v115_v5 = vld [vmem:[#allocation8 + $0x8] sm:$0xff]  ;;  %v118_v6 = vmul.f32 -0.5, %v112_v2  ;;  %v119_v7 = vmul.f32 -0.5, %v113_v3  ;;  %v124_v8 = vsub.f32 %v110_v0, %v114_v4  ;;  %v116_v21 = vld [vmem:[#allocation9] sm:$0xff]  ;;  %v117_v23 = vld [vmem:[#allocation9 + $0x8] sm:$0xff]  ;;  %v134_v25 = vmul.f32 0.5, %v112_v2 }
  0x16   :  { %v125_v9 = vsub.f32 %v111_v1, %v115_v5  ;;  %v135_v29 = vmul.f32 0.5, %v113_v3  ;;  %v152_v34 = vsub.f32 %v114_v4, %v116_v21  ;;  %v153_v37 = vsub.f32 %v115_v5, %v117_v23 }
  0x17   :  { %v120_v10 = vmul.f32 1.442695, %v118_v6  ;;  %v122_v11 = vmul.f32 1.442695, %v119_v7  ;;  %v126_v12 = vmul.f32 0.5, %v124_v8 }
  0x18   :  { %v142_v13 = vmax.f32 %v118_v6, -9.2103405  ;;  %v127_v14 = vmul.f32 0.5, %v125_v9  ;;  %v143_v15 = vmax.f32 %v119_v7, -9.2103405  ;;  %v154_v43 = vmul.f32 %v152_v34, %v152_v34 }
  0x19   :  { %201 = vpow2.f32 %v120_v10  ;;  %v128_v16 = vmul.f32 %v126_v12, %v124_v8  ;;  %v155_v45 = vmul.f32 %v153_v37, %v153_v37 }
  0x1a   :  { %203 = vpow2.f32 %v122_v11  ;;  %v144_v17 = vmin.f32 %v142_v13, -0.000100005  ;;  %v129_v18 = vmul.f32 %v127_v14, %v125_v9  ;;  %v145_v19 = vmin.f32 %v143_v15, -0.000100005 }
  0x1c   :  { %v146_v27 = vmul.f32 1.442695, %v144_v17  ;;  %v147_v31 = vmul.f32 1.442695, %v145_v19 }
  0x1f   :  { %v202_v20 = vpop.eup %201 }
  0x20   :  { %v204_v22 = vpop.eup %203  ;;  %v130_v24 = vmul.f32 %v202_v20, %v128_v16  ;;  %v138_v26 = vmax.f32 %v202_v20, 0.0001 }
  0x21   :  { %v131_v28 = vmul.f32 %v204_v22, %v129_v18  ;;  %v139_v30 = vmax.f32 %v204_v22, 0.0001 }
  0x22   :  { %v132_v32 = vmul.f32 %v202_v20, %v130_v24  ;;  %v140_v33 = vmin.f32 %v138_v26, 0.9999 }
  0x23   :  { %v133_v35 = vmul.f32 %v204_v22, %v131_v28  ;;  %v141_v36 = vmin.f32 %v139_v30, 0.9999 }
  0x24   :  { %v136_v38 = vadd.f32 %v134_v25, %v132_v32  ;;  %v148_v39 = vmul.f32 %v146_v27, %v140_v33 }
  0x25   :  { %v137_v40 = vadd.f32 %v135_v29, %v133_v35  ;;  %v149_v41 = vmul.f32 %v147_v31, %v141_v36 }
  0x26   :  { %v150_v42 = vsub.f32 0.0, %v148_v39 }
  0x27   :  { %v151_v44 = vsub.f32 0.0, %v149_v41 }
  0x28   :  { %v156_v46 = vadd.f32 %v150_v42, %v136_v38 }
  0x29   :  { %v157_v47 = vadd.f32 %v151_v44, %v137_v40 }
  0x2a   :  { %v158_v48 = vadd.f32 %v156_v46, %v154_v43 }
  0x2b   :  { %v159_v49 = vadd.f32 %v157_v47, %v155_v45 }
  0x2d   :  { %v161_v50 = vadd.f32 %v159_v49, %v158_v48 }
  0x2f   :  { %v168_v51 = vrot.slane %v161_v50, 4 }
  0x31   :  { %v169_v52 = vadd.f32 %v168_v51, %v161_v50 }
  0x33   :  { %v170_v53 = vrot.slane %v169_v52, 2 }
  0x35   :  { %v171_v54 = vadd.f32 %v170_v53, %v169_v52 }
  0x37   :  { %v172_v55 = vrot.slane %v171_v54, 1 }
  0x39   :  { %v173_v56 = vadd.f32 %v172_v55, %v171_v54 }
  0x3b   :  { %174 = vst [vmem:[#allocation11] sm:$0x1] %v173_v56 }
  0x3c   :  { %185 = dma.vmem_to_hbm [thread:$0]  %s181_s3, 16, %s183_s11, [#allocation5]  }
  0x3d   :  { %331 = dma.done.wait [#allocation5], 16  }
  0x3e   :  { %332 = vsyncadd [#allocation5], 4294967280 }
  0x3f   :  { %190 = vsyncpa [#allocation4], 1 }
  0x40   :  { %191 = vsyncpa [#allocation7], 1 }
  0x41   :  { %192 = vsyncpa [#allocation10], 1 }
  0x42   :  { %193 = vsyncpa [#allocation5], 1 }

</bundles_post_ra>
